<compile_context>
chip_gen: v7x
topology: tpu7x:2x2x1
jax: 0.10.0
libtpu: 0.0.40
codegen_flags: <defaults>
</compile_context>

<pallas_src>
import functools
import math

import jax
import jax.numpy as jnp
import numpy as np
from jax.experimental import pallas as pl
from jax.experimental.pallas import tpu as pltpu


# ---------------------------------------------------------------------------
# Kernel
# ---------------------------------------------------------------------------
def _pe_add_kernel(pos_ref, fp_ref, x_ref, o_ref):
    """out = x + sin(pos * freq + phase) over a (TM, D_eff) tile.

    pos_ref: (TM, F)        f32  per-row positions.  F == 1 in the plain layout;
                                 F == 128 // d_model in the lane-folded layout
                                 (F logical rows packed into one 128-lane row).
    fp_ref:  (F + 1, D_eff) f32  rows 0..F-1: freq masked to its lane group,
                                 row F: phase (0 / pi/2).  Resident block.
    x_ref:   (TM, D_eff)    x.dtype
    o_ref:   (TM, D_eff)    x.dtype (aliased onto x's HBM buffer)
    """
    f = pos_ref.shape[1]                       # static fold factor (<= 8)
    pos = pos_ref[...]                         # (TM, F)
    angle = fp_ref[f:f + 1, :]                 # phase row, broadcasts to (TM, D)
    for j in range(f):                         # static unroll; exact f32 math
        angle = angle + pos[:, j:j + 1] * fp_ref[j:j + 1, :]
    # Single EUP transcendental; add in x's dtype (bf16 add on v6e/v7x VPUs).
    o_ref[...] = x_ref[...] + jnp.sin(angle).astype(o_ref.dtype)


# ---------------------------------------------------------------------------
# Host-side helpers
# ---------------------------------------------------------------------------
@functools.lru_cache(maxsize=None)
def _fp_table(d_model: int, fold: int):
    """(fold+1, d_model*fold) constants: rows 0..fold-1 = freq (masked to its
    own d_model-wide lane group), row fold = phase.  Cached per (d_model, fold)."""
    c = np.arange(d_model)
    freq = np.exp(((c // 2) * 2).astype(np.float32) * (-math.log(10000.0) / d_model))
    phase = np.where(c % 2 == 0, 0.0, math.pi / 2.0).astype(np.float32)
    d_eff = d_model * fold
    fp = np.zeros((fold + 1, d_eff), np.float32)
    for j in range(fold):
        fp[j, j * d_model:(j + 1) * d_model] = freq
    fp[fold, :] = np.tile(phase, fold)
    return jnp.asarray(fp)


def _pick_tile(rows: int, d_eff: int, itemsize: int, requested_tm):
    """Row-tile size: as large as a 24 MiB VMEM working set allows (fits v7x's
    64 MiB/TC with headroom, trivially fits v5e/v6e's 128 MiB), while keeping
    >= ~8 grid steps on large inputs so the 'parallel' axis shards across both
    v7x TensorCores with pipelining on each."""
    sub = {4: 8, 2: 16, 1: 32}.get(itemsize, 8)
    # Double-buffered x + out blocks, plus the lane-padded (TM, F)->128 pos block.
    per_row = 2 * (2 * d_eff * itemsize + 128 * 4)
    budget = 24 << 20
    tm = budget // per_row if requested_tm is None else min(requested_tm, budget // per_row)
    tm = min(tm, max(2048, pl.cdiv(rows, 8)))      # >=8 steps, but never tiny tiles
    tm = max(sub, (tm // sub) * sub)
    tm = min(tm, pl.cdiv(rows, sub) * sub)         # don't over-pad small inputs
    return tm


@functools.partial(jax.jit, static_argnames=("tm", "fold"), donate_argnums=(2,))
def _pe_call(pos, fp, x, *, tm, fold):
    n, d_model = x.shape
    rows, d_eff = n // fold, d_model * fold
    itemsize = x.dtype.itemsize
    # Contiguous row-major reshapes -> bitcasts under jit, no HBM traffic.
    x2 = x.reshape(rows, d_eff)
    pos2 = pos.reshape(rows, fold)

    grid = (pl.cdiv(rows, tm),)
    per_row = 2 * (2 * d_eff * itemsize + 128 * 4)
    footprint = tm * per_row + 8 * max(128, d_eff) * 4        # + resident fp
    vmem_limit = int(min(40 << 20, max(footprint + (4 << 20), 16 << 20)))

    out = pl.pallas_call(
        _pe_add_kernel,
        out_shape=jax.ShapeDtypeStruct((rows, d_eff), x.dtype),
        grid=grid,
        in_specs=[
            pl.BlockSpec((tm, fold), lambda i: (i, 0)),           # pos (per-row)
            pl.BlockSpec((fold + 1, d_eff), lambda i: (0, 0)),    # freq/phase (resident)
            pl.BlockSpec((tm, d_eff), lambda i: (i, 0)),          # x
        ],
        out_specs=pl.BlockSpec((tm, d_eff), lambda i: (i, 0)),
        compiler_params=pltpu.CompilerParams(
            dimension_semantics=("parallel",),
            vmem_limit_bytes=vmem_limit,
        ),
        input_output_aliases={2: 0},   # write in place into x's (donated) buffer
    )(pos2, fp, x2)
    return out.reshape(n, d_model)


def positional_encoding(x, dia_len=None, *, pos=None, tm=None):
    """Forward of PositionalEncoding (eval mode: Dropout(p=0.1) is identity).

    x:       [N, d_model] — flat concatenation of all dialogues along dim 0
             (the PyTorch forward's size-1 batch dim is squeezed away).
    dia_len: python list of per-dialogue lengths, sum == N; the position
             counter restarts at 0 for every dialogue.
    pos:     optional precomputed per-row positions, shape (N,) or (N, 1),
             passed as a device array to avoid per-call host work / transfer.

    NOTE: x's buffer is donated and the result is written in place
    (input_output_aliases); do not reuse `x` after this call.
    """
    n, d_model = x.shape
    if pos is None:
        assert dia_len is not None and sum(dia_len) == n, \
            "dia_len must sum to the total sequence length"
        pos_np = np.concatenate([np.arange(l, dtype=np.float32) for l in dia_len])
        pos = jnp.asarray(pos_np.reshape(n, 1))
    else:
        pos = jnp.asarray(pos, dtype=jnp.float32).reshape(n, 1)

    # Layout choice: for small d_model dividing 128, fold 128//d_model logical
    # rows into one 128-lane row (lane-dense unmasked stores, no padding and no
    # extra traffic).  Otherwise keep the natural layout — a last dim that is
    # not a multiple of 128 just gets masked stores, which is cheaper than a
    # host-side pad copy + output slice.
    fold = 1
    if (d_model < 128 and 128 % d_model == 0 and (128 // d_model) <= 8
            and n % (128 // d_model) == 0):
        fold = 128 // d_model

    rows, d_eff = n // fold, d_model * fold
    fp = _fp_table(d_model, fold)
    tm = _pick_tile(rows, d_eff, x.dtype.itemsize, tm)

    # TODO(synk): training-mode dropout (pltpu.prng_seed + stateful_bernoulli)
    # is intentionally not applied; eval-mode dropout is the identity.
    return _pe_call(pos, fp, x, tm=tm, fold=fold)


# ---------------------------------------------------------------------------
# Reference & demo
# ---------------------------------------------------------------------------
def _reference(x_np, dia_len):
    """NumPy reference mirroring the PyTorch forward (eval mode)."""
    n, d_model = x_np.shape
    pos = np.concatenate([np.arange(l, dtype=np.float32) for l in dia_len])[:, None]
    k = np.arange(0, d_model, 2, dtype=np.float32)
    div_term = np.exp(k * (-math.log(10000.0) / d_model))
    pe = np.zeros((n, d_model), dtype=np.float32)
    pe[:, 0::2] = np.sin(pos * div_term)
    pe[:, 1::2] = np.cos(pos * div_term)
    return x_np + pe


if __name__ == "__main__":
    key = jax.random.PRNGKey(0)
    d_model = 32
    dia_len = [5, 3, 8]            # dialogue segment lengths (positions restart per segment)
    n = sum(dia_len)               # 16 rows total
    x = jax.random.normal(key, (n, d_model), dtype=jnp.float32)

    x_np = np.asarray(x)           # snapshot BEFORE the call (x's buffer is donated)
    ref = _reference(x_np, dia_len)

    out = positional_encoding(x, dia_len)
    out = jax.block_until_ready(out)

    np.testing.assert_allclose(np.asarray(out), ref, rtol=1e-5, atol=1e-5)
    print("KERNEL_OK")
</pallas_src>

<mosaic_0001>
module attributes {stable_mosaic.version = 11 : i64} {
  func.func @_pe_add_kernel(%arg0: i32, %arg1: memref<8x4xf32, #tpu.memory_space<vmem>>, %arg2: memref<5x128xf32, #tpu.memory_space<vmem>>, %arg3: memref<8x128xf32, #tpu.memory_space<vmem>>, %arg4: memref<8x128xf32, #tpu.memory_space<vmem>>) attributes {dimension_semantics = [#tpu.dimension_semantics<parallel>], iteration_bounds = array<i64: 1>, scalar_prefetch = 0 : i64, scratch_operands = 0 : i64, tpu.core_type = #tpu.core_type<tc>, window_params = [{transform_indices = @transform_0, window_bounds = array<i64: 8, 4>}, {pipeline_mode = #tpu.pipeline_mode<synchronous>, transform_indices = @transform_1, window_bounds = array<i64: 5, 128>}, {transform_indices = @transform_2, window_bounds = array<i64: 8, 128>}, {transform_indices = @transform_3, window_bounds = array<i64: 8, 128>}]} {
    %c0 = arith.constant 0 : index
    %c0_0 = arith.constant 0 : index
    %0 = vector.load %arg1[%c0, %c0_0] : memref<8x4xf32, #tpu.memory_space<vmem>>, vector<8x4xf32>
    %c4 = arith.constant 4 : index
    %c0_1 = arith.constant 0 : index
    %1 = vector.load %arg2[%c4, %c0_1] : memref<5x128xf32, #tpu.memory_space<vmem>>, vector<1x128xf32>
    %2 = vector.extract_strided_slice %0 {offsets = [0, 0], sizes = [8, 1], strides = [1, 1]} : vector<8x4xf32> to vector<8x1xf32>
    %c0_2 = arith.constant 0 : index
    %c0_3 = arith.constant 0 : index
    %3 = vector.load %arg2[%c0_2, %c0_3] : memref<5x128xf32, #tpu.memory_space<vmem>>, vector<1x128xf32>
    %4 = vector.broadcast %2 : vector<8x1xf32> to vector<8x128xf32>
    %5 = vector.broadcast %3 : vector<1x128xf32> to vector<8x128xf32>
    %6 = arith.mulf %4, %5 : vector<8x128xf32>
    %7 = vector.broadcast %1 : vector<1x128xf32> to vector<8x128xf32>
    %8 = arith.addf %7, %6 : vector<8x128xf32>
    %9 = vector.extract_strided_slice %0 {offsets = [0, 1], sizes = [8, 1], strides = [1, 1]} : vector<8x4xf32> to vector<8x1xf32>
    %c1 = arith.constant 1 : index
    %c0_4 = arith.constant 0 : index
    %10 = vector.load %arg2[%c1, %c0_4] : memref<5x128xf32, #tpu.memory_space<vmem>>, vector<1x128xf32>
    %11 = vector.broadcast %9 : vector<8x1xf32> to vector<8x128xf32>
    %12 = vector.broadcast %10 : vector<1x128xf32> to vector<8x128xf32>
    %13 = arith.mulf %11, %12 : vector<8x128xf32>
    %14 = arith.addf %8, %13 : vector<8x128xf32>
    %15 = vector.extract_strided_slice %0 {offsets = [0, 2], sizes = [8, 1], strides = [1, 1]} : vector<8x4xf32> to vector<8x1xf32>
    %c2 = arith.constant 2 : index
    %c0_5 = arith.constant 0 : index
    %16 = vector.load %arg2[%c2, %c0_5] : memref<5x128xf32, #tpu.memory_space<vmem>>, vector<1x128xf32>
    %17 = vector.broadcast %15 : vector<8x1xf32> to vector<8x128xf32>
    %18 = vector.broadcast %16 : vector<1x128xf32> to vector<8x128xf32>
    %19 = arith.mulf %17, %18 : vector<8x128xf32>
    %20 = arith.addf %14, %19 : vector<8x128xf32>
    %21 = vector.extract_strided_slice %0 {offsets = [0, 3], sizes = [8, 1], strides = [1, 1]} : vector<8x4xf32> to vector<8x1xf32>
    %c3 = arith.constant 3 : index
    %c0_6 = arith.constant 0 : index
    %22 = vector.load %arg2[%c3, %c0_6] : memref<5x128xf32, #tpu.memory_space<vmem>>, vector<1x128xf32>
    %23 = vector.broadcast %21 : vector<8x1xf32> to vector<8x128xf32>
    %24 = vector.broadcast %22 : vector<1x128xf32> to vector<8x128xf32>
    %25 = arith.mulf %23, %24 : vector<8x128xf32>
    %26 = arith.addf %20, %25 : vector<8x128xf32>
    %c0_7 = arith.constant 0 : index
    %c0_8 = arith.constant 0 : index
    %27 = vector.load %arg3[%c0_7, %c0_8] : memref<8x128xf32, #tpu.memory_space<vmem>>, vector<8x128xf32>
    %28 = math.sin %26 : vector<8x128xf32>
    %29 = arith.addf %27, %28 : vector<8x128xf32>
    %c0_9 = arith.constant 0 : index
    %c0_10 = arith.constant 0 : index
    %30 = vector.load %arg4[%c0_9, %c0_10] : memref<8x128xf32, #tpu.memory_space<vmem>>, vector<8x128xf32>
    tpu.vector_store %arg4[%c0_9, %c0_10], %29 {strides = array<i32>} : memref<8x128xf32, #tpu.memory_space<vmem>>, vector<8x128xf32>,
    return
  }
  func.func @transform_0(%arg0: i32) -> (i32, i32) {
    %c0_i32 = arith.constant 0 : i32
    %c0_i32_0 = arith.constant 0 : i32
    return %arg0, %c0_i32 : i32, i32
  }
  func.func @transform_1(%arg0: i32) -> (i32, i32) {
    %c0_i32 = arith.constant 0 : i32
    %c0_i32_0 = arith.constant 0 : i32
    %c0_i32_1 = arith.constant 0 : i32
    return %c0_i32, %c0_i32_0 : i32, i32
  }
  func.func @transform_2(%arg0: i32) -> (i32, i32) {
    %c0_i32 = arith.constant 0 : i32
    %c0_i32_0 = arith.constant 0 : i32
    return %arg0, %c0_i32 : i32, i32
  }
  func.func @transform_3(%arg0: i32) -> (i32, i32) {
    %c0_i32 = arith.constant 0 : i32
    %c0_i32_0 = arith.constant 0 : i32
    return %arg0, %c0_i32 : i32, i32
  }
}

</mosaic_0001>

<bundles_post_ra>
// kernel: _pe_call.1
= control target key start
LH: loop header
LB: loop body
LE: loop exit
PB: predicated region body
PF: predicated region fallthrough
CT: control target
= control target key end

     0   :  { %v243_v1 = vmov 0   ;;  %v244_v2 = vmov 2   ;;  %v245_v3 = vmov 1   ;;  %v246_v4 = vmov 3   ;;  %s318_s0 = inlined_call_operand.vmem [shape: f32[4,4], index: 0, kind: input, shape index: {}]   ;;  %s319_s1 = inlined_call_operand.vmem [shape: f32[5,128], index: 1, kind: input, shape index: {}]   ;;  %s320_s2 = inlined_call_operand.vmem [shape: f32[4,128], index: 2, kind: input, shape index: {}, may-alias: {2,3}]   ;;  %s321_s3 = inlined_call_operand.vmem [shape: f32[4,128], index: 3, kind: output, shape index: {}, may-alias: {2,3}]  }
   0x1   :  { %v14_v0 = vld [vmem:[%s318_s0] sm:$0xff]  ;;  %234 = vset.pattern.permute.xlu0 %v243_v1  ;;  %236 = vset.pattern.permute.xlu1 %v244_v2  ;;  %v247_v32 = vmov 683565275   ;;  %v248_v34 = vmov 2475754826  }
   0x2   :  { %19 = vperm.xlu0 %234, %v14_v0   ;;  %45 = vperm.xlu1 %236, %v14_v0   ;;  %v211_v5 = vld [vmem:[%s319_s1] ss:$0 sm:$0xff]  ;;  %v212_v9 = vld [vmem:[%s319_s1 + $0x4] ss:$0 sm:$0xff]  ;;  %v213_v10 = vld [vmem:[%s319_s1 + $0x1] ss:$0 sm:$0xff] }
   0x3   :  { %v214_v11 = vld [vmem:[%s319_s1 + $0x2] ss:$0 sm:$0xff]  ;;  %v215_v13 = vld [vmem:[%s319_s1 + $0x3] ss:$0 sm:$0xff]  ;;  %v249_v37 = vmov 2131351028  }
   0x4   :  { %v250_v40 = vmov 2102212464   ;;  %v251_v43 = vmov 920167782   ;;  %v252_v46 = vmov 1326507024  }
   0x6   :  { %235 = vset.pattern.permute.xlu0 %v245_v3  ;;  %237 = vset.pattern.permute.xlu1 %v246_v4 }
   0x7   :  { %34 = vperm.xlu0 %235, %v14_v0   ;;  %56 = vperm.xlu1 %237, %v14_v0  }
   0xb   :  { %238 = vset.pattern.permute.xlu0 %v246_v4 }
  0x81   :  { %v20_v6 = vpop.permute.xlu0 %19  ;;  %v46_v7 = vpop.permute.xlu1 %45 }
  0x82   :  { %v26_v8 = vmul.f32 %v211_v5, %v20_v6  ;;  %v52_v17 = vmul.f32 %v214_v11, %v46_v7 }
  0x84   :  { %v31_v15 = vadd.f32 %v212_v9, %v26_v8 }
  0x86   :  { %v35_v12 = vpop.permute.xlu0 %34  ;;  %v57_v14 = vpop.permute.xlu1 %56 }
  0x87   :  { %v41_v16 = vmul.f32 %v213_v10, %v35_v12  ;;  %v63_v19 = vmul.f32 %v215_v13, %v57_v14 }
  0x89   :  { %v42_v18 = vadd.f32 %v41_v16, %v31_v15 }
  0x8b   :  { %v53_v20 = vadd.f32 %v52_v17, %v42_v18 }
  0x8d   :  { %v291_v21 = vadd.f32 %v63_v19, %v53_v20 }
  0x8f   :  { %v69_v22 = vand.u32 2139095040, %v291_v21  ;;  %v66_v26 = vand.u32 2147483647, %v291_v21  ;;  %vm68_vm7 = vcmp.lt.s32.totalorder %v291_v21, 0  ;;  %vm158_vm12 = vweird.f32 %v291_v21 }
  0x91   :  { %v70_v23 = vshrl.u32 %v69_v22, 23  ;;  %v73_v29 = vand.u32 8388607, %v66_v26  ;;  %vm67_vm8 = vcmp.le.f32.partialorder %v66_v26, 0.7853982  ;;  %v65_v26 = vld [vmem:[%s320_s2] sm:$0xff] }
  0x93   :  { %v216_v24 = vadd.s32 4294967169, %v70_v23  ;;  %v74_v48 = vor.u32 8388608, %v73_v29 }
  0x95   :  { %v76_v25 = vadd.s32 1, %v216_v24  ;;  %v114_v62 = vshll.u32 %v74_v48, 8 }
  0x97   :  { %vm77_vm0 = vcmp.gt.s32.totalorder %v76_v25, 0 }
  0x98   :  { %v78_v27 = vsel %vm77_vm0, %v76_v25, 0 }
  0x99   :  { %v80_v28 = vand.u32 31, %v78_v27  ;;  %v79_v31 = vshrl.u32 %v78_v27, 5 }
  0x9b   :  { %v81_v30 = vsub.s32 32, %v80_v28  ;;  %v83_v33 = vshll.u32 %v247_v32, %v80_v28  ;;  %v86_v35 = vshll.u32 %v248_v34, %v80_v28  ;;  %v89_v39 = vshll.u32 %v249_v37, %v80_v28 }
  0x9c   :  { %v92_v42 = vshll.u32 %v250_v40, %v80_v28  ;;  %v95_v45 = vshll.u32 %v251_v43, %v80_v28  ;;  %vm98_vm1 = vcmp.lt.s32.totalorder %v79_v31, 1  ;;  %vm101_vm2 = vcmp.lt.s32.totalorder %v79_v31, 4 }
  0x9d   :  { %v84_v36 = vshrl.u32 %v248_v34, %v81_v30  ;;  %v87_v38 = vshrl.u32 %v249_v37, %v81_v30  ;;  %v90_v41 = vshrl.u32 %v250_v40, %v81_v30  ;;  %v93_v44 = vshrl.u32 %v251_v43, %v81_v30 }
  0x9e   :  { %v96_v47 = vshrl.u32 %v252_v46, %v81_v30  ;;  %v82_v57 = vshrl.u32 %v247_v32, %v81_v30  ;;  %vm100_vm3 = vcmp.lt.s32.totalorder %v79_v31, 3  ;;  %vm99_vm4 = vcmp.lt.s32.totalorder %v79_v31, 2 }
  0x9f   :  { %v85_v49 = vor.u32 %v84_v36, %v83_v33  ;;  %v88_v50 = vor.u32 %v87_v38, %v86_v35  ;;  %v91_v51 = vor.u32 %v90_v41, %v89_v39  ;;  %v94_v52 = vor.u32 %v93_v44, %v92_v42 }
  0xa0   :  { %v97_v53 = vor.u32 %v96_v47, %v95_v45 }
  0xa1   :  { %v103_v54 = vsel %vm101_vm2, %v91_v51, 2102212464  ;;  %v106_v55 = vsel %vm98_vm1, %v85_v49, %v88_v50  ;;  %v110_v56 = vsel %vm98_vm1, %v88_v50, %v91_v51  ;;  %v107_v58 = vsel %vm101_vm2, %v94_v52, 920167782 }
  0xa2   :  { %v111_v59 = vsel %vm101_vm2, %v97_v53, 1326507024  ;;  %v108_v60 = vsel %vm100_vm3, %v91_v51, %v107_v58  ;;  %v102_v63 = vsel %vm98_vm1, %v82_v57, %v85_v49  ;;  %v104_v0 = vsel %vm100_vm3, %v88_v50, %v103_v54 }
  0xa3   :  { %v112_v61 = vsel %vm100_vm3, %v94_v52, %v111_v59  ;;  %v109_v1 = vsel %vm99_vm4, %v106_v55, %v108_v60  ;;  %v105_v7 = vsel %vm99_vm4, %v102_v63, %v104_v0 }
  0xa4   :  { %v113_v2 = vsel %vm99_vm4, %v110_v56, %v112_v61  ;;  %v300_v5 = vmul.u32.u64.low %v114_v62, %v109_v1  ;;  %v301_v6 = vmul.u32.u64.high %v114_v62, %v109_v1, %v300_v5  ;;  %v121_v9 = vmul.u32 %v114_v62, %v105_v7 }
  0xa5   :  { %v297_v3 = vmul.u32.u64.low %v114_v62, %v113_v2  ;;  %v298_v4 = vmul.u32.u64.high %v114_v62, %v113_v2, %v297_v3 }
  0xa6   :  { %v124_v8 = vadd.s32 1, %v301_v6 }
  0xa7   :  { %vm123_vm5 = vc.u32 %v298_v4, %v300_v5  ;;  %v122_v22 = vadd.s32 %v300_v5, %v298_v4 }
  0xa8   :  { %v125_v10 = vsel %vm123_vm5, %v124_v8, %v301_v6 }
  0xa9   :  { %v126_v11 = vadd.s32 %v125_v10, %v121_v9 }
  0xab   :  { %v127_v12 = vadd.s32 536870912, %v126_v11 }
  0xad   :  { %v128_v13 = vshrl.u32 %v127_v12, 30 }
  0xaf   :  { %v129_v14 = vshll.u32 %v128_v13, 30  ;;  %v152_v35 = vsub.s32 4, %v128_v13 }
  0xb1   :  { %v130_v15 = vsub.s32 %v126_v11, %v129_v14  ;;  %v153_v38 = vsel %vm68_vm7, %v152_v35, %v128_v13 }
  0xb2   :  { %v155_v40 = vsel %vm67_vm8, 0, %v153_v38 }
  0xb3   :  { %v132_v16 = vsub.s32 0, %v130_v15  ;;  %v159_v41 = vadd.s32 3, %v155_v40 }
  0xb5   :  { %v217_v17 = vmin.u32 %v132_v16, %v130_v15  ;;  %v160_v42 = vand.u32 3, %v159_v41 }
  0xb7   :  { %v134_v18 = vclz %v217_v17  ;;  %vm165_vm9 = vcmp.eq.s32.totalorder %v160_v42, 2  ;;  %vm162_vm10 = vcmp.eq.s32.totalorder %v160_v42, 0  ;;  %vm161_vm11 = vcmp.lt.s32.totalorder %v160_v42, 2 }
  0xb9   :  { %v218_v19 = vadd.s32 4294967294, %v134_v18 }
  0xbb   :  { %vm219_vm6 = vcmp.lt.s32.totalorder %v218_v19, 0 }
  0xbc   :  { %v137_v20 = vsel %vm219_vm6, 0, %v218_v19 }
  0xbd   :  { %v138_v23 = vsub.s32 32, %v137_v20  ;;  %v142_v24 = vsub.s32 4294967266, %v137_v20  ;;  %v139_v25 = vshll.u32 %v130_v15, %v137_v20 }
  0xbf   :  { %v140_v27 = vshrl.u32 %v122_v22, %v138_v23  ;;  %v143_v28 = vadd.s32 127, %v142_v24 }
  0xc1   :  { %v141_v29 = vor.u32 %v140_v27, %v139_v25  ;;  %v144_v30 = vshll.u32 %v143_v28, 23 }
  0xc3   :  { %v145_v31 = vor.u32 4788187, %v144_v30  ;;  %v148_v33 = vcvt.s32.f32 %v141_v29 }
  0xc5   :  { %v146_v32 = vand.u32 2147483647, %v145_v31 }
  0xc7   :  { %v149_v34 = vmul.f32 %v148_v33, %v146_v32 }
  0xc9   :  { %v150_v36 = vxor.u32 2147483648, %v149_v34 }
  0xcb   :  { %v151_v37 = vsel %vm68_vm7, %v150_v36, %v149_v34 }
  0xcc   :  { %v154_v39 = vsel %vm67_vm8, %v291_v21, %v151_v37 }
  0xcd   :  { %239 = vcosq.f32 %v154_v39 }
  0xce   :  { %241 = vsinq.f32 %v154_v39 }
  0xd7   :  { %v240_v43 = vpop.eup %239 }
  0xd8   :  { %v242_v44 = vpop.eup %241  ;;  %v166_v45 = vxor.u32 2147483648, %v240_v43 }
  0xd9   :  { %v163_v46 = vxor.u32 2147483648, %v242_v44 }
  0xda   :  { %v167_v47 = vsel %vm165_vm9, %v166_v45, %v242_v44 }
  0xdb   :  { %v164_v48 = vsel %vm162_vm10, %v240_v43, %v163_v46 }
  0xdc   :  { %v168_v49 = vsel %vm161_vm11, %v164_v48, %v167_v47 }
  0xdd   :  { %v169_v50 = vsel %vm158_vm12, nan, %v168_v49 }
  0xde   :  { %v170_v51 = vadd.f32 %v169_v50, %v65_v26 }
  0xe0   :  { %171 = vst [vmem:[#allocation2] sm:$0xff] %v170_v51 }
  0xe7   :  { %v189_v52 = vld [vmem:[#allocation2] sm:$0xf] }
  0xe8   :  { %190 = vst [vmem:[%s321_s3] sm:$0xf] %v189_v52 }

</bundles_post_ra>
